<compile_context>
chip_gen: v7x
topology: tpu7x:2x2x1
jax: 0.10.0
libtpu: 0.0.40
codegen_flags: <defaults>
</compile_context>

<pallas_src>
import jax
import jax.numpy as jnp
from jax.experimental import pallas as pl
from jax.experimental.pallas import tpu as pltpu

_WIDTH_CANDIDATES = (8192, 4096, 2048, 1024, 512, 384, 256, 128)
_TARGET_BLOCK_BYTES = 2 * 1024 * 1024   # ~2 MiB/block; x2 (in+out) x2 (dbl-buffer) = 8 MiB VMEM
_MAX_BLOCK_BYTES = 8 * 1024 * 1024      # bail out on pathological single-block layouts
_SMALL_INPUT_BYTES = 128 * 1024         # below this, plain XLA x*0.0 is strictly cheaper


def _sublane_multiple(dtype) -> int:
    """Minimum second-to-last tile dim for this dtype (8 f32 / 16 bf16 / 32 int8-fp8)."""
    return max(8, 32 // jnp.dtype(dtype).itemsize)


def _zero_mul_kernel(x_ref, o_ref):
    # Faithful x.mul(0.0): preserves NaN/Inf -> NaN and -0.0, unlike a pure fill.
    o_ref[...] = (x_ref[...] * 0.0).astype(o_ref.dtype)


def _zero_mul(x, *, min_pallas_bytes=_SMALL_INPUT_BYTES):
    """x.mul(0.0) for an arbitrary-shape array, Pallas-accelerated when worthwhile."""
    n = x.size
    itemsize = jnp.dtype(x.dtype).itemsize
    if n == 0 or n * itemsize < min_pallas_bytes:
        return x * 0.0  # tiny/empty: custom-call + grid-step overhead would dominate

    # Lane-dense 2D view (rows, width): width is the widest multiple of 128 dividing n
    # exactly, so the reshape is a free contiguous reshape (no pad / trim HBM passes).
    rows, width = None, None
    for cand in _WIDTH_CANDIDATES:
        if n % cand == 0:
            rows, width = n // cand, cand
            break
    if rows is None:
        # n not a multiple of 128: natural trailing-dim view (block last dim = full dim).
        width = x.shape[-1] if x.ndim >= 2 else n
        rows = n // width

    sub = _sublane_multiple(x.dtype)
    tile_m = max(sub, (_TARGET_BLOCK_BYTES // (width * itemsize)) // sub * sub)
    if rows <= tile_m:
        tile_m = rows                       # single block; equals full dim -> always legal
    if tile_m * width * itemsize > _MAX_BLOCK_BYTES:
        return x * 0.0                      # pathological shape: not worth a custom call
    grid_m = pl.cdiv(rows, tile_m)          # ragged last row-block handled by Pallas masking

    x2 = x.reshape(rows, width)             # contiguous reshape: no extra HBM pass
    y2 = pl.pallas_call(
        _zero_mul_kernel,
        out_shape=jax.ShapeDtypeStruct((rows, width), x.dtype),
        grid=(grid_m,),
        in_specs=[pl.BlockSpec((tile_m, width), lambda i: (i, 0))],
        out_specs=pl.BlockSpec((tile_m, width), lambda i: (i, 0)),
        compiler_params=pltpu.CompilerParams(
            dimension_semantics=("parallel",)),   # shards the row grid over v7x's 2 TCs
    )(x2)
    return y2.reshape(x.shape)


def zero_forward(x, stride, *, min_pallas_bytes=_SMALL_INPUT_BYTES):
    """JAX/Pallas equivalent of Zero(stride).forward(x) for NCHW input x."""
    if stride != 1:
        # Spatial ::stride subsampling (compacting XLA slice). Kept wrapper-side so the
        # kernel never depends on lane-strided loads; the strided path is cold in DARTS.
        # TODO(synk): fuse the H/W stride into the kernel (index_map over H_out rows +
        #             strided pl.ds on the lane axis) to drop this extra HBM pass.
        x = x[:, :, ::stride, ::stride]
    return _zero_mul(x, min_pallas_bytes=min_pallas_bytes)


if __name__ == "__main__":
    key = jax.random.PRNGKey(0)
    N, C, H, W = 2, 4, 16, 16
    x = jax.random.normal(key, (N, C, H, W), jnp.float32)

    # --- spec shape, default path (small-input fast path) ---
    y1 = jax.block_until_ready(zero_forward(x, stride=1))
    assert y1.shape == (N, C, H, W), y1.shape
    assert bool(jnp.all(y1 == 0.0))

    y2 = jax.block_until_ready(zero_forward(x, stride=2))
    assert y2.shape == (N, C, H // 2, W // 2), y2.shape
    assert bool(jnp.all(y2 == 0.0))

    # --- spec shape, forced through the Pallas kernel (checks NaN propagation too) ---
    x_nan = x.at[0, 0, 0, 0].set(jnp.nan)
    y3 = jax.block_until_ready(zero_forward(x_nan, stride=1, min_pallas_bytes=0))
    assert y3.shape == (N, C, H, W), y3.shape
    assert bool(jnp.isnan(y3[0, 0, 0, 0]))                 # x.mul(0.0) keeps NaN
    assert bool(jnp.all((y3 == 0.0) | jnp.isnan(y3)))

    y4 = jax.block_until_ready(zero_forward(x_nan, stride=2, min_pallas_bytes=0))
    assert y4.shape == (N, C, H // 2, W // 2), y4.shape
    assert bool(jnp.isnan(y4[0, 0, 0, 0]))
    assert bool(jnp.all((y4 == 0.0) | jnp.isnan(y4)))

    # --- larger inputs: exercise the tiled kernel path (incl. ragged last row-block) ---
    xa = jax.random.normal(jax.random.PRNGKey(1), (2, 36, 64, 128), jnp.float32)
    ya = jax.block_until_ready(zero_forward(xa, stride=1))   # rows=72, tile_m=64 -> ragged tail
    assert ya.shape == xa.shape and bool(jnp.all(ya == 0.0))

    xb = jax.random.normal(jax.random.PRNGKey(2), (2, 8, 128, 128), jnp.float32)
    yb = jax.block_until_ready(zero_forward(xb, stride=2))
    assert yb.shape == (2, 8, 64, 64) and bool(jnp.all(yb == 0.0))

    xc = jax.random.normal(jax.random.PRNGKey(3), (2, 16, 64, 128), jnp.float32).astype(jnp.bfloat16)
    yc = jax.block_until_ready(zero_forward(xc, stride=1))   # bf16: sublane multiple 16
    assert yc.shape == xc.shape and bool(jnp.all(yc == 0.0))

    print("KERNEL_OK")
</pallas_src>

<mosaic_0001>
module attributes {stable_mosaic.version = 11 : i64} {
  func.func @_zero_mul_kernel(%arg0: i32, %arg1: memref<1x2048xf32, #tpu.memory_space<vmem>>, %arg2: memref<1x2048xf32, #tpu.memory_space<vmem>>) attributes {dimension_semantics = [#tpu.dimension_semantics<parallel>], iteration_bounds = array<i64: 1>, scalar_prefetch = 0 : i64, scratch_operands = 0 : i64, tpu.core_type = #tpu.core_type<tc>, window_params = [{transform_indices = @transform_0, window_bounds = array<i64: 1, 2048>}, {transform_indices = @transform_1, window_bounds = array<i64: 1, 2048>}]} {
    %c0 = arith.constant 0 : index
    %c0_0 = arith.constant 0 : index
    %0 = vector.load %arg1[%c0, %c0_0] : memref<1x2048xf32, #tpu.memory_space<vmem>>, vector<1x2048xf32>
    %cst = arith.constant 0.000000e+00 : f32
    %1 = vector.broadcast %cst : f32 to vector<1x2048xf32>
    %2 = arith.mulf %0, %1 : vector<1x2048xf32>
    %c0_1 = arith.constant 0 : index
    %c0_2 = arith.constant 0 : index
    %3 = vector.load %arg2[%c0_1, %c0_2] : memref<1x2048xf32, #tpu.memory_space<vmem>>, vector<1x2048xf32>
    tpu.vector_store %arg2[%c0_1, %c0_2], %2 {strides = array<i32>} : memref<1x2048xf32, #tpu.memory_space<vmem>>, vector<1x2048xf32>,
    return
  }
  func.func @transform_0(%arg0: i32) -> (i32, i32) {
    %c0_i32 = arith.constant 0 : i32
    %c0_i32_0 = arith.constant 0 : i32
    return %arg0, %c0_i32 : i32, i32
  }
  func.func @transform_1(%arg0: i32) -> (i32, i32) {
    %c0_i32 = arith.constant 0 : i32
    %c0_i32_0 = arith.constant 0 : i32
    return %arg0, %c0_i32 : i32, i32
  }
}

</mosaic_0001>

<bundles_post_ra>
// kernel: tpu_custom_call.1
= control target key start
LH: loop header
LB: loop body
LE: loop exit
PB: predicated region body
PF: predicated region fallthrough
CT: control target
= control target key end

     0   :  { %6 = vsyncpa [#allocation3], 0  ;;  %s128_s0 = inlined_call_operand.hbm [shape: f32[1,2048], index: 0, kind: input, shape index: {}]   ;;  %s129_s1 = inlined_call_operand.hbm [shape: f32[1,2048], index: 1, kind: output, shape index: {}]  }
   0x1   :  { %7 = vsyncpa [#allocation4], 0  ;;  %s92_s6 = smov [#allocation2]   ;;  %s44_s10 = scalar_lea.hbm %s128_s0, 256 }
   0x2   :  { %s14_s7 = sshll.u32 %s92_s6, 4  ;;  %p45_p0 = scmp.ne.s32.totalorder %s128_s0, %s44_s10  ;;  %s15_s7 = int_to_ptr.vmem [resolvable:$true] %s14_s7 }
   0x3   :  { %p48_p1 = scmp.lt.u32.totalorder %s44_s10, %s128_s0 }
   0x5   :  { %p50_p2 = pnand %p48_p1, %p45_p0 }
   0x7   :  { %53 = shalt.err (!%p50_p2)
}
   0x8   :  { %s54_s15 = scalar_lea.vmem %s15_s7, 256  ;;  %p59_p4 = scmp.lt.s32.totalorder %s15_s7, %s15_s7 }
   0x9   :  { %p55_p3 = scmp.ne.s32.totalorder %s15_s7, %s54_s15  ;;  %p60_p5 = scmp.lt.s32.totalorder %s54_s15, %s54_s15 }
   0xb   :  { %p61_p6 = por %p60_p5, %p59_p4 }
   0xd   :  { %p62_p7 = pnand %p61_p6, %p55_p3 }
   0xf   :  { %65 = shalt.err (!%p62_p7)
}
  0x10   :  { %17 = dma.hbm_to_vmem [thread:$0]  %s128_s0, 256, %s15_s7, [#allocation3]  }
  0x11   :  { %88 = dma.done.wait [#allocation3], 256  }
  0x12   :  { %89 = vsyncadd [#allocation3], 4294967040  ;;  %s93_s18 = smov [#allocation5]   ;;  %v21_v0 = vld [vmem:[#allocation2] sm:$0xff]  ;;  %v22_v1 = vld [vmem:[#allocation2 + $0x8] sm:$0xff] }
  0x13   :  { %s33_s19 = sshll.u32 %s93_s18, 4  ;;  %v23_v2 = vmul.f32 0.0, %v21_v0  ;;  %v24_v3 = vmul.f32 0.0, %v22_v1  ;;  %s34_s19 = int_to_ptr.vmem [resolvable:$true] %s33_s19 }
  0x14   :  { %s66_s20 = scalar_lea.vmem %s34_s19, 256  ;;  %p71_p9 = scmp.lt.s32.totalorder %s34_s19, %s34_s19 }
  0x15   :  { %25 = vst [vmem:[#allocation5] sm:$0xff] %v23_v2  ;;  %26 = vst [vmem:[#allocation5 + $0x8] sm:$0xff] %v24_v3  ;;  %p67_p8 = scmp.ne.s32.totalorder %s34_s19, %s66_s20  ;;  %p72_p10 = scmp.lt.s32.totalorder %s66_s20, %s66_s20 }
  0x17   :  { %p73_p11 = por %p72_p10, %p71_p9 }
  0x19   :  { %p74_p12 = pnand %p73_p11, %p67_p8 }
  0x1b   :  { %77 = shalt.err (!%p74_p12)
}
  0x1c   :  { %s78_s22 = scalar_lea.hbm %s129_s1, 256 }
  0x1d   :  { %p79_p13 = scmp.ne.s32.totalorder %s129_s1, %s78_s22  ;;  %p82_p0 = scmp.lt.u32.totalorder %s78_s22, %s129_s1 }
  0x1f   :  { %p84_p1 = pnand %p82_p0, %p79_p13 }
  0x21   :  { %87 = shalt.err (!%p84_p1)
}
  0x22   :  { %36 = dma.vmem_to_hbm [thread:$0]  %s34_s19, 256, %s129_s1, [#allocation4]  }
  0x23   :  { %90 = dma.done.wait [#allocation4], 256  }
  0x24   :  { %91 = vsyncadd [#allocation4], 4294967040 }
  0x25   :  { %40 = vsyncpa [#allocation3], 1 }
  0x26   :  { %41 = vsyncpa [#allocation4], 1 }

</bundles_post_ra>
